<compile_context>
chip_gen: v6e
topology: v6e:2x2x1
jax: 0.10.0
libtpu: 0.0.40
codegen_flags: <defaults>
</compile_context>

<pallas_src>
import functools

import jax
import jax.numpy as jnp
from jax.experimental import pallas as pl
from jax.experimental.pallas import tpu as pltpu

_BN_EPS = 1e-5


def mlp_kernel(x_ref, bn_ref, w1_ref, w2_ref, b2_ref, o_ref, *scratch,
               batch_real, needs_mask, use_scratch):
    k = pl.program_id(1)
    acc_ref = scratch[0] if use_scratch else o_ref

    @pl.when(k == 0)
    def _():
        acc_ref[...] = jnp.zeros_like(acc_ref)

    # ---- Linear(dim -> hidden), this H tile only (native dtype on the MXU) ----
    h = jnp.dot(x_ref[...], w1_ref[...],
                preferred_element_type=jnp.float32)                 # (Bp, TH) f32
    h = h + bn_ref[0:1, :].astype(jnp.float32)                      # + b1

    # ---- BatchNorm1d over the REAL batch rows (biased batch statistics) ----
    inv_b = 1.0 / float(batch_real)
    if needs_mask:
        # (Bp, 1) mask; broadcasts across lanes instead of a full (Bp, TH) mask.
        row_ids = jax.lax.broadcasted_iota(jnp.int32, (h.shape[0], 1), 0)
        mask = (row_ids < batch_real).astype(jnp.float32)
        hm = h * mask
        mean = jnp.sum(hm, axis=0, keepdims=True) * inv_b           # (1, TH)
        ex2 = jnp.sum(hm * h, axis=0, keepdims=True) * inv_b        # E[h^2]
    else:
        mean = jnp.sum(h, axis=0, keepdims=True) * inv_b
        ex2 = jnp.sum(h * h, axis=0, keepdims=True) * inv_b
    var = jnp.maximum(ex2 - mean * mean, 0.0)                       # clamp fp cancellation
    h = (h - mean) * jax.lax.rsqrt(var + _BN_EPS)
    h = h * bn_ref[1:2, :].astype(jnp.float32) + bn_ref[2:3, :].astype(jnp.float32)

    # ---- ReLU ----
    h = jnp.maximum(h, 0.0)

    # ---- Linear(hidden -> projection): accumulate this H tile's contribution ----
    acc_ref[...] += jnp.dot(h.astype(w2_ref.dtype), w2_ref[...],
                            preferred_element_type=jnp.float32)

    @pl.when(k == pl.num_programs(1) - 1)
    def _():
        o_ref[...] = (acc_ref[...] + b2_ref[...].astype(jnp.float32)
                      ).astype(o_ref.dtype)


def _round_up(v, m):
    return ((v + m - 1) // m) * m


def _align_dim(n):
    """128-align; prefer 256 (v6e/v7x MXU width) when the extra padding is <=12.5%."""
    a128 = _round_up(n, 128)
    a256 = _round_up(n, 256)
    if a256 - n <= max(n // 8, 0):
        return a256
    return a128


def _pad2d(a, rows, cols, fill=0.0):
    r, c = a.shape
    if r == rows and c == cols:
        return a
    return jnp.pad(a, ((0, rows - r), (0, cols - c)), constant_values=fill)


def _vmem_capacity_bytes():
    try:
        info = pltpu.get_tpu_info()
        cap = getattr(info, "vmem_capacity_bytes", None)
        if cap:
            return int(cap)
    except Exception:
        pass
    return 64 << 20  # conservative default (v7x per-TensorCore)


def _plan_tiles(Bp, Dp, Hp, Pp, s_isz, o_isz, use_scratch, budget):
    """Pick (tp, th) so the FULL resident VMEM footprint fits the budget."""
    th_cands = sorted({c for c in (Hp, 4096, 2048, 1024, 512, 256, 128)
                       if c <= Hp and Hp % c == 0}, reverse=True)
    if Pp <= 2048:
        tp_cands = [Pp]
    else:
        tp_cands = [c for c in (2048, 1024, 512, 256) if Pp % c == 0]
    for tp in tp_cands:
        fixed = (2 * Bp * Dp * s_isz                       # x (invariant block, double-buffered)
                 + 2 * Bp * tp * o_isz                     # resident output tile
                 + (Bp * tp * 4 if use_scratch else 0)     # f32 accumulator scratch
                 + 2 * 8 * tp * 4)                         # b2 slice (sublane-padded)
        for th in th_cands:
            step = (2 * Dp * th * s_isz                    # w1 column tile (double-buffered)
                    + 2 * th * tp * s_isz                  # w2 row tile (double-buffered)
                    + 2 * 8 * th * 4                       # packed b1/gamma/beta slice
                    + 3 * Bp * th * 4)                     # live f32 BN/ReLU intermediates
            if fixed + step <= budget:
                return tp, th
    return tp_cands[-1], th_cands[-1]


def mlp_forward(x, w1, b1, gamma, beta, w2, b2, *, stream_dtype=jnp.bfloat16):
    """x: (B, D); w1: (D, H); b1/gamma/beta: (1, H); w2: (H, P); b2: (1, P).

    stream_dtype: dtype used to stream x/w1/w2 through HBM->MXU (bf16 by default;
    pass jnp.float32 for a bit-accurate path).  Accumulation/BN math is f32.
    """
    B, D = x.shape
    H = w1.shape[1]
    P = w2.shape[1]

    out_dtype = x.dtype
    sdt = jnp.dtype(stream_dtype) if stream_dtype is not None else jnp.dtype(x.dtype)
    s_isz = sdt.itemsize
    o_isz = jnp.dtype(out_dtype).itemsize
    sublane = 8 if s_isz >= 4 else (16 if s_isz == 2 else 32)

    Bp = max(_round_up(B, sublane), 128)
    if Bp > 128 and _round_up(Bp, 256) - Bp <= Bp // 8:
        Bp = _round_up(Bp, 256)                    # prefer 256 M-dim when cheap
    Dp = _round_up(D, 128)
    Hp = _align_dim(H)
    Pp = _align_dim(P)

    use_scratch = jnp.dtype(out_dtype) != jnp.dtype(jnp.float32)

    cap = _vmem_capacity_bytes()
    budget = min(int(cap * 0.625), 96 << 20)       # ~40 MiB on v7x, ~80 MiB on v5e/v6e
    vmem_limit = int(min(int(cap * 0.75), budget + (16 << 20)))
    tp, th = _plan_tiles(Bp, Dp, Hp, Pp, s_isz, o_isz, use_scratch, budget)
    n_p = Pp // tp
    n_h = Hp // th

    # Pad everything to lane/sublane-friendly shapes (padded columns/rows are
    # zero, so they contribute nothing and are sliced off at the end).
    xp = _pad2d(x, Bp, Dp).astype(sdt)
    w1p = _pad2d(w1, Dp, Hp).astype(sdt)
    w2p = _pad2d(w2, Hp, Pp).astype(sdt)
    b2p = _pad2d(b2.astype(jnp.float32), 1, Pp)

    # Pack b1 / gamma / beta into one (8, Hp) f32 slab -> a single per-step DMA.
    bn = jnp.zeros((8, Hp), jnp.float32)
    bn = bn.at[0, :H].set(b1.reshape(-1).astype(jnp.float32))
    bn = bn.at[1, :H].set(gamma.reshape(-1).astype(jnp.float32))
    bn = bn.at[2, :H].set(beta.reshape(-1).astype(jnp.float32))

    needs_mask = (B != Bp)
    kernel = functools.partial(mlp_kernel, batch_real=B, needs_mask=needs_mask,
                               use_scratch=use_scratch)
    scratch = [pltpu.VMEM((Bp, tp), jnp.float32)] if use_scratch else []

    out = pl.pallas_call(
        kernel,
        out_shape=jax.ShapeDtypeStruct((Bp, Pp), out_dtype),
        grid=(n_p, n_h),
        in_specs=[
            pl.BlockSpec((Bp, Dp), lambda p, k: (0, 0)),     # x (resident / invariant)
            pl.BlockSpec((8, th), lambda p, k: (0, k)),      # packed b1/gamma/beta slice
            pl.BlockSpec((Dp, th), lambda p, k: (0, k)),     # w1 column tile
            pl.BlockSpec((th, tp), lambda p, k: (k, p)),     # w2 row tile
            pl.BlockSpec((1, tp), lambda p, k: (0, p)),      # b2 (finalize only)
        ],
        out_specs=pl.BlockSpec((Bp, tp), lambda p, k: (0, p)),
        scratch_shapes=scratch,
        compiler_params=pltpu.CompilerParams(
            dimension_semantics=("parallel", "arbitrary"),
            vmem_limit_bytes=vmem_limit,
        ),
    )(xp, bn, w1p, w2p, b2p)

    return out[:B, :P]


def init_mlp_params(key, dim, projection_size, hidden_size):
    """Deterministic synthetic parameters matching the module's shapes."""
    k1, k2, k3, k4 = jax.random.split(key, 4)
    # nn.Linear(dim, hidden): weight (hidden, dim) -> stored transposed (dim, hidden)
    w1 = jax.random.normal(k1, (dim, hidden_size), jnp.float32) * (1.0 / jnp.sqrt(dim))
    b1 = jax.random.normal(k2, (1, hidden_size), jnp.float32) * 0.01
    # BatchNorm1d(hidden) default init: gamma=1, beta=0
    gamma = jnp.ones((1, hidden_size), jnp.float32)
    beta = jnp.zeros((1, hidden_size), jnp.float32)
    # nn.Linear(hidden, projection_size): stored transposed (hidden, projection)
    w2 = jax.random.normal(k3, (hidden_size, projection_size), jnp.float32) * (
        1.0 / jnp.sqrt(hidden_size))
    b2 = jax.random.normal(k4, (1, projection_size), jnp.float32) * 0.01
    return w1, b1, gamma, beta, w2, b2


def reference_mlp(x, w1, b1, gamma, beta, w2, b2):
    h = x @ w1 + b1
    mean = jnp.mean(h, axis=0, keepdims=True)
    var = jnp.mean((h - mean) ** 2, axis=0, keepdims=True)
    h = (h - mean) * jax.lax.rsqrt(var + _BN_EPS) * gamma + beta
    h = jnp.maximum(h, 0.0)
    return h @ w2 + b2


if __name__ == "__main__":
    # Small shapes consistent with MLP(dim, projection_size, hidden_size)
    batch, dim, hidden_size, projection_size = 8, 32, 64, 16

    key = jax.random.PRNGKey(0)
    kx, kp = jax.random.split(key)
    x = jax.random.normal(kx, (batch, dim), jnp.float32)
    params = init_mlp_params(kp, dim, projection_size, hidden_size)

    ref = reference_mlp(x, *params)

    # Bit-accurate path (f32 streaming): tight tolerance vs the f32 reference.
    out_f32 = jax.block_until_ready(mlp_forward(x, *params, stream_dtype=jnp.float32))
    assert out_f32.shape == (batch, projection_size)
    assert jnp.allclose(out_f32, ref, atol=1e-4, rtol=1e-4), float(
        jnp.max(jnp.abs(out_f32 - ref)))

    # Default fast path (bf16 weight/activation streaming, f32 accumulation):
    # looser tolerance accounts for the bf16 rounding of streamed operands.
    out_bf16 = jax.block_until_ready(mlp_forward(x, *params))
    assert out_bf16.shape == (batch, projection_size)
    err = float(jnp.max(jnp.abs(out_bf16 - ref)))
    scale = float(jnp.max(jnp.abs(ref))) + 1e-6
    assert err <= 0.05 * scale + 0.05, err

    print("KERNEL_OK")
</pallas_src>

<mosaic_0001>
module attributes {stable_mosaic.version = 11 : i64} {
  func.func @mlp_kernel(%arg0: i32, %arg1: i32, %arg2: memref<128x128xf32, #tpu.memory_space<vmem>>, %arg3: memref<8x128xf32, #tpu.memory_space<vmem>>, %arg4: memref<128x128xf32, #tpu.memory_space<vmem>>, %arg5: memref<128x128xf32, #tpu.memory_space<vmem>>, %arg6: memref<1x128xf32, #tpu.memory_space<vmem>>, %arg7: memref<128x128xf32, #tpu.memory_space<vmem>>) attributes {dimension_semantics = [#tpu.dimension_semantics<parallel>, #tpu.dimension_semantics<arbitrary>], iteration_bounds = array<i64: 1, 1>, scalar_prefetch = 0 : i64, scratch_operands = 0 : i64, tpu.core_type = #tpu.core_type<tc>, window_params = [{pipeline_mode = #tpu.pipeline_mode<synchronous>, transform_indices = @transform_0, window_bounds = array<i64: 128, 128>}, {transform_indices = @transform_1, window_bounds = array<i64: 8, 128>}, {transform_indices = @transform_2, window_bounds = array<i64: 128, 128>}, {transform_indices = @transform_3, window_bounds = array<i64: 128, 128>}, {transform_indices = @transform_4, window_bounds = array<i64: 1, 128>}, {transform_indices = @transform_5, window_bounds = array<i64: 128, 128>}]} {
    %c0_i32 = arith.constant 0 : i32
    %0 = arith.cmpi eq, %arg1, %c0_i32 : i32
    %1 = arith.extui %0 : i1 to i32
    %c0_i32_0 = arith.constant 0 : i32
    %2 = arith.cmpi ne, %1, %c0_i32_0 : i32
    scf.if %2 {
      %cst_24 = arith.constant 0.000000e+00 : f32
      %52 = vector.broadcast %cst_24 : f32 to vector<128x128xf32>
      %c0_25 = arith.constant 0 : index
      %c0_26 = arith.constant 0 : index
      %53 = vector.load %arg7[%c0_25, %c0_26] : memref<128x128xf32, #tpu.memory_space<vmem>>, vector<128x128xf32>
      tpu.vector_store %arg7[%c0_25, %c0_26], %52 {strides = array<i32>} : memref<128x128xf32, #tpu.memory_space<vmem>>, vector<128x128xf32>,
    } else {
    }
    %c0 = arith.constant 0 : index
    %c0_1 = arith.constant 0 : index
    %3 = vector.load %arg2[%c0, %c0_1] : memref<128x128xf32, #tpu.memory_space<vmem>>, vector<128x128xf32>
    %c0_2 = arith.constant 0 : index
    %c0_3 = arith.constant 0 : index
    %4 = vector.load %arg4[%c0_2, %c0_3] : memref<128x128xf32, #tpu.memory_space<vmem>>, vector<128x128xf32>
    %cst = arith.constant dense<0.000000e+00> : vector<128x128xf32>
    %5 = tpu.matmul %3, %4, %cst {dimension_numbers = #tpu.dot_dimension_numbers<[1], [0], [0], [1], [0, 0, 1, 1], [], []>} : vector<128x128xf32>, vector<128x128xf32>, vector<128x128xf32> -> vector<128x128xf32>
    %c0_4 = arith.constant 0 : index
    %c0_5 = arith.constant 0 : index
    %6 = vector.load %arg3[%c0_4, %c0_5] : memref<8x128xf32, #tpu.memory_space<vmem>>, vector<1x128xf32>
    %7 = vector.broadcast %6 : vector<1x128xf32> to vector<128x128xf32>
    %8 = arith.addf %5, %7 : vector<128x128xf32>
    %9 = tpu.iota {dimensions = array<i32: 0>} : vector<128x1xi32>
    %c8_i32 = arith.constant 8 : i32
    %10 = vector.broadcast %c8_i32 : i32 to vector<128x1xi32>
    %11 = arith.cmpi slt, %9, %10 : vector<128x1xi32>
    %12 = arith.extui %11 : vector<128x1xi1> to vector<128x1xi32>
    %13 = arith.sitofp %12 : vector<128x1xi32> to vector<128x1xf32>
    %14 = vector.broadcast %13 : vector<128x1xf32> to vector<128x128xf32>
    %15 = arith.mulf %8, %14 : vector<128x128xf32>
    %cst_6 = arith.constant dense<0.000000e+00> : vector<128xf32>
    %16 = vector.multi_reduction <add>, %15, %cst_6 [0] : vector<128x128xf32> to vector<128xf32>
    %17 = vector.shape_cast %16 : vector<128xf32> to vector<1x128xf32>
    %cst_7 = arith.constant 1.250000e-01 : f32
    %18 = vector.broadcast %cst_7 : f32 to vector<1x128xf32>
    %19 = arith.mulf %17, %18 : vector<1x128xf32>
    %20 = arith.mulf %15, %8 : vector<128x128xf32>
    %cst_8 = arith.constant dense<0.000000e+00> : vector<128xf32>
    %21 = vector.multi_reduction <add>, %20, %cst_8 [0] : vector<128x128xf32> to vector<128xf32>
    %22 = vector.shape_cast %21 : vector<128xf32> to vector<1x128xf32>
    %cst_9 = arith.constant 1.250000e-01 : f32
    %23 = vector.broadcast %cst_9 : f32 to vector<1x128xf32>
    %24 = arith.mulf %22, %23 : vector<1x128xf32>
    %25 = arith.mulf %19, %19 : vector<1x128xf32>
    %26 = arith.subf %24, %25 : vector<1x128xf32>
    %cst_10 = arith.constant 0.000000e+00 : f32
    %27 = vector.broadcast %cst_10 : f32 to vector<1x128xf32>
    %28 = arith.maximumf %26, %27 : vector<1x128xf32>
    %29 = vector.broadcast %19 : vector<1x128xf32> to vector<128x128xf32>
    %30 = arith.subf %8, %29 : vector<128x128xf32>
    %cst_11 = arith.constant 9.99999974E-6 : f32
    %31 = vector.broadcast %cst_11 : f32 to vector<1x128xf32>
    %32 = arith.addf %28, %31 : vector<1x128xf32>
    %33 = math.rsqrt %32 : vector<1x128xf32>
    %34 = vector.broadcast %33 : vector<1x128xf32> to vector<128x128xf32>
    %35 = arith.mulf %30, %34 : vector<128x128xf32>
    %c1 = arith.constant 1 : index
    %c0_12 = arith.constant 0 : index
    %36 = vector.load %arg3[%c1, %c0_12] : memref<8x128xf32, #tpu.memory_space<vmem>>, vector<1x128xf32>
    %37 = vector.broadcast %36 : vector<1x128xf32> to vector<128x128xf32>
    %38 = arith.mulf %35, %37 : vector<128x128xf32>
    %c2 = arith.constant 2 : index
    %c0_13 = arith.constant 0 : index
    %39 = vector.load %arg3[%c2, %c0_13] : memref<8x128xf32, #tpu.memory_space<vmem>>, vector<1x128xf32>
    %40 = vector.broadcast %39 : vector<1x128xf32> to vector<128x128xf32>
    %41 = arith.addf %38, %40 : vector<128x128xf32>
    %cst_14 = arith.constant 0.000000e+00 : f32
    %42 = vector.broadcast %cst_14 : f32 to vector<128x128xf32>
    %43 = arith.maximumf %41, %42 : vector<128x128xf32>
    %c0_15 = arith.constant 0 : index
    %c0_16 = arith.constant 0 : index
    %44 = vector.load %arg7[%c0_15, %c0_16] : memref<128x128xf32, #tpu.memory_space<vmem>>, vector<128x128xf32>
    %c0_17 = arith.constant 0 : index
    %c0_18 = arith.constant 0 : index
    %45 = vector.load %arg5[%c0_17, %c0_18] : memref<128x128xf32, #tpu.memory_space<vmem>>, vector<128x128xf32>
    %cst_19 = arith.constant dense<0.000000e+00> : vector<128x128xf32>
    %46 = tpu.matmul %43, %45, %cst_19 {dimension_numbers = #tpu.dot_dimension_numbers<[1], [0], [0], [1], [0, 0, 1, 1], [], []>} : vector<128x128xf32>, vector<128x128xf32>, vector<128x128xf32> -> vector<128x128xf32>
    %47 = arith.addf %44, %46 : vector<128x128xf32>
    %c0_20 = arith.constant 0 : index
    %c0_21 = arith.constant 0 : index
    %48 = vector.load %arg7[%c0_20, %c0_21] : memref<128x128xf32, #tpu.memory_space<vmem>>, vector<128x128xf32>
    tpu.vector_store %arg7[%c0_20, %c0_21], %47 {strides = array<i32>} : memref<128x128xf32, #tpu.memory_space<vmem>>, vector<128x128xf32>,
    %c0_i32_22 = arith.constant 0 : i32
    %49 = arith.cmpi eq, %arg1, %c0_i32_22 : i32
    %50 = arith.extui %49 : i1 to i32
    %c0_i32_23 = arith.constant 0 : i32
    %51 = arith.cmpi ne, %50, %c0_i32_23 : i32
    scf.if %51 {
      %c0_24 = arith.constant 0 : index
      %c0_25 = arith.constant 0 : index
      %52 = vector.load %arg7[%c0_24, %c0_25] : memref<128x128xf32, #tpu.memory_space<vmem>>, vector<128x128xf32>
      %c0_26 = arith.constant 0 : index
      %c0_27 = arith.constant 0 : index
      %53 = vector.load %arg6[%c0_26, %c0_27] : memref<1x128xf32, #tpu.memory_space<vmem>>, vector<1x128xf32>
      %54 = vector.broadcast %53 : vector<1x128xf32> to vector<128x128xf32>
      %55 = arith.addf %52, %54 : vector<128x128xf32>
      %c0_28 = arith.constant 0 : index
      %c0_29 = arith.constant 0 : index
      %56 = vector.load %arg7[%c0_28, %c0_29] : memref<128x128xf32, #tpu.memory_space<vmem>>, vector<128x128xf32>
      tpu.vector_store %arg7[%c0_28, %c0_29], %55 {strides = array<i32>} : memref<128x128xf32, #tpu.memory_space<vmem>>, vector<128x128xf32>,
    } else {
    }
    return
  }
  func.func @transform_0(%arg0: i32, %arg1: i32) -> (i32, i32) {
    %c0_i32 = arith.constant 0 : i32
    %c0_i32_0 = arith.constant 0 : i32
    %c0_i32_1 = arith.constant 0 : i32
    return %c0_i32, %c0_i32_0 : i32, i32
  }
  func.func @transform_1(%arg0: i32, %arg1: i32) -> (i32, i32) {
    %c0_i32 = arith.constant 0 : i32
    %c0_i32_0 = arith.constant 0 : i32
    return %c0_i32, %arg1 : i32, i32
  }
  func.func @transform_2(%arg0: i32, %arg1: i32) -> (i32, i32) {
    %c0_i32 = arith.constant 0 : i32
    %c0_i32_0 = arith.constant 0 : i32
    return %c0_i32, %arg1 : i32, i32
  }
  func.func @transform_3(%arg0: i32, %arg1: i32) -> (i32, i32) {
    %c0_i32 = arith.constant 0 : i32
    return %arg1, %arg0 : i32, i32
  }
  func.func @transform_4(%arg0: i32, %arg1: i32) -> (i32, i32) {
    %c0_i32 = arith.constant 0 : i32
    %c0_i32_0 = arith.constant 0 : i32
    return %c0_i32, %arg0 : i32, i32
  }
  func.func @transform_5(%arg0: i32, %arg1: i32) -> (i32, i32) {
    %c0_i32 = arith.constant 0 : i32
    %c0_i32_0 = arith.constant 0 : i32
    return %c0_i32, %arg0 : i32, i32
  }
}

</mosaic_0001>

<bundles_post_ra>
// kernel: tpu_custom_call.1
= control target key start
LH: loop header
LB: loop body
LE: loop exit
PB: predicated region body
PF: predicated region fallthrough
CT: control target
= control target key end

     0   :  { %10 = vsyncpa [#allocation3], 0  ;;  %s1336_s0 = inlined_call_operand.hbm [shape: f32[128,128], index: 0, kind: input, shape index: {}]   ;;  %s1337_s1 = inlined_call_operand.hbm [shape: f32[8,128], index: 1, kind: input, shape index: {}]   ;;  %s1338_s2 = inlined_call_operand.hbm [shape: f32[128,128], index: 2, kind: input, shape index: {}]   ;;  %s1339_s3 = inlined_call_operand.hbm [shape: f32[128,128], index: 3, kind: input, shape index: {}]   ;;  %s1340_s4 = inlined_call_operand.vmem [shape: f32[1,128], index: 4, kind: input, shape index: {}]   ;;  %s1341_s5 = inlined_call_operand.hbm [shape: f32[128,128], index: 5, kind: output, shape index: {}]  }
   0x1   :  { %11 = vsyncpa [#allocation6], 0 }
   0x2   :  { %12 = vsyncpa [#allocation9], 0 }
   0x3   :  { %13 = vsyncpa [#allocation4], 0  ;;  %s1096_s18 = smov [#allocation5]   ;;  %s1097_s20 = smov [#allocation2]  }
   0x4   :  { %s32_s19 = sshll.u32 %s1096_s18, 4  ;;  %s19_s21 = sshll.u32 %s1097_s20, 4  ;;  %s33_s19 = int_to_ptr.vmem [resolvable:$true] %s32_s19  ;;  %s20_s21 = int_to_ptr.vmem [resolvable:$true] %s19_s21 }
   0x5   :  { %s996_s22 = scalar_lea.vmem %s33_s19, 128  ;;  %p1001_p1 = scmp.lt.s32.totalorder %s33_s19, %s33_s19 }
   0x6   :  { %p997_p0 = scmp.ne.s32.totalorder %s33_s19, %s996_s22  ;;  %p1002_p2 = scmp.lt.s32.totalorder %s996_s22, %s996_s22 }
   0x8   :  { %p1003_p3 = por %p1002_p2, %p1001_p1 }
   0xa   :  { %p1004_p4 = pnand %p1003_p3, %p997_p0 }
   0xc   :  { %1007 = shalt.err (!%p1004_p4)
}
   0xd   :  { %35 = dma.hbm_to_vmem [thread:$0]  %s1337_s1, 128, %s33_s19, [#allocation6]  }
   0xe   :  { %s1016_s25 = scalar_lea.vmem %s20_s21, 2048  ;;  %p1021_p6 = scmp.lt.s32.totalorder %s20_s21, %s20_s21 }
   0xf   :  { %p1017_p5 = scmp.ne.s32.totalorder %s20_s21, %s1016_s25  ;;  %p1022_p7 = scmp.lt.s32.totalorder %s1016_s25, %s1016_s25 }
  0x11   :  { %p1023_p8 = por %p1022_p7, %p1021_p6 }
  0x13   :  { %p1024_p9 = pnand %p1023_p8, %p1017_p5 }
  0x15   :  { %1027 = shalt.err (!%p1024_p9)
}
  0x16   :  { %s1098_s26 = smov 128   ;;  %s1099_s27 = smov 8  }
  0x17   :  { %25 = dma.hbm_to_vmem [thread:$0]  %s1336_s0, 2048, %s20_s21, [#allocation3], %s1098_s26, %s1098_s26, %s1099_s27  }
  0x18   :  { %s1100_s30 = smov [#allocation7]   ;;  %s1101_s7 = smov [#allocation8]  }
  0x19   :  { %s41_s6 = sshll.u32 %s1100_s30, 4  ;;  %s53_s1 = sshll.u32 %s1101_s7, 4  ;;  %s42_s6 = int_to_ptr.vmem [resolvable:$true] %s41_s6  ;;  %s54_s1 = int_to_ptr.vmem [resolvable:$true] %s53_s1 }
  0x1a   :  { %s1036_s8 = scalar_lea.vmem %s42_s6, 2048  ;;  %p1041_p11 = scmp.lt.s32.totalorder %s42_s6, %s42_s6 }
  0x1b   :  { %p1037_p10 = scmp.ne.s32.totalorder %s42_s6, %s1036_s8  ;;  %p1042_p12 = scmp.lt.s32.totalorder %s1036_s8, %s1036_s8 }
  0x1d   :  { %p1043_p13 = por %p1042_p12, %p1041_p11 }
  0x1f   :  { %p1044_p0 = pnand %p1043_p13, %p1037_p10 }
  0x21   :  { %1047 = shalt.err (!%p1044_p0)
}
  0x22   :  { %47 = dma.hbm_to_vmem [thread:$0]  %s1338_s2, 2048, %s42_s6, [#allocation6], %s1098_s26, %s1098_s26, %s1099_s27  }
  0x23   :  { %s1056_s0 = scalar_lea.vmem %s54_s1, 2048  ;;  %p1061_p2 = scmp.lt.s32.totalorder %s54_s1, %s54_s1 }
  0x24   :  { %p1057_p1 = scmp.ne.s32.totalorder %s54_s1, %s1056_s0  ;;  %p1062_p3 = scmp.lt.s32.totalorder %s1056_s0, %s1056_s0 }
  0x26   :  { %p1063_p4 = por %p1062_p3, %p1061_p2 }
  0x28   :  { %p1064_p5 = pnand %p1063_p4, %p1057_p1 }
  0x2a   :  { %1067 = shalt.err (!%p1064_p5)
}
  0x2b   :  { %59 = dma.hbm_to_vmem [thread:$0]  %s1339_s3, 2048, %s54_s1, [#allocation9], %s1098_s26, %s1098_s26, %s1099_s27  }
  0x2c   :  { %1088 = dma.done.wait [#allocation3], 2048  }
  0x2d   :  { %1089 = vsyncadd [#allocation3], 4294965248 }
  0x2e   :  { %1090 = dma.done.wait [#allocation6], 2176  }
  0x2f   :  { %1091 = vsyncadd [#allocation6], 4294965120 }
  0x30   :  { %1092 = dma.done.wait [#allocation9], 2048  }
  0x31   :  { %1093 = vsyncadd [#allocation9], 4294965248  ;;  %v125_v0 = vld [vmem:[#allocation7 + $0x78] sm:$0xff]  ;;  %v124_v1 = vld [vmem:[#allocation7 + $0x70] sm:$0xff] }
  0x32   :  { %866 = vmatprep.subr.mxu0 %v125_v0  ;;  %v123_v2 = vld [vmem:[#allocation7 + $0x68] sm:$0xff]  ;;  %v122_v3 = vld [vmem:[#allocation7 + $0x60] sm:$0xff]  ;;  %v94_v4 = vld [vmem:[#allocation2] sm:$0xff] }
  0x33   :  { %867 = vmatpush3.msra.mxu0 %v125_v0  ;;  %v121_v5 = vld [vmem:[#allocation7 + $0x58] sm:$0xff]  ;;  %898 = vmatprep.mubr.f32.mxu0 %v94_v4  ;;  %v120_v6 = vld [vmem:[#allocation7 + $0x50] sm:$0xff]  ;;  %v119_v7 = vld [vmem:[#allocation7 + $0x48] sm:$0xff] }
  0x34   :  { %868 = vmatprep.subr.mxu0 %v124_v1  ;;  %v118_v8 = vld [vmem:[#allocation7 + $0x40] sm:$0xff]  ;;  %v117_v9 = vld [vmem:[#allocation7 + $0x38] sm:$0xff]  ;;  %v116_v10 = vld [vmem:[#allocation7 + $0x30] sm:$0xff] }
  0x35   :  { %869 = vmatpush3.msra.mxu0 %v124_v1  ;;  %v115_v11 = vld [vmem:[#allocation7 + $0x28] sm:$0xff]  ;;  %v114_v12 = vld [vmem:[#allocation7 + $0x20] sm:$0xff]  ;;  %v113_v13 = vld [vmem:[#allocation7 + $0x18] sm:$0xff] }
  0x36   :  { %870 = vmatprep.subr.mxu0 %v123_v2  ;;  %v112_v14 = vld [vmem:[#allocation7 + $0x10] sm:$0xff]  ;;  %v111_v15 = vld [vmem:[#allocation7 + $0x8] sm:$0xff]  ;;  %v110_v16 = vld [vmem:[#allocation7] sm:$0xff] }
  0x37   :  { %871 = vmatpush3.msra.mxu0 %v123_v2  ;;  %v95_v17 = vld [vmem:[#allocation2 + $0x8] sm:$0xff]  ;;  %v96_v18 = vld [vmem:[#allocation2 + $0x10] sm:$0xff]  ;;  %v97_v19 = vld [vmem:[#allocation2 + $0x18] sm:$0xff] }
  0x38   :  { %872 = vmatprep.subr.mxu0 %v122_v3  ;;  %v98_v20 = vld [vmem:[#allocation2 + $0x20] sm:$0xff]  ;;  %v99_v21 = vld [vmem:[#allocation2 + $0x28] sm:$0xff]  ;;  %v100_v22 = vld [vmem:[#allocation2 + $0x30] sm:$0xff] }
  0x39   :  { %873 = vmatpush3.msra.mxu0 %v122_v3  ;;  %v101_v23 = vld [vmem:[#allocation2 + $0x38] sm:$0xff]  ;;  %v102_v24 = vld [vmem:[#allocation2 + $0x40] sm:$0xff]  ;;  %v103_v25 = vld [vmem:[#allocation2 + $0x48] sm:$0xff] }
  0x3a   :  { %874 = vmatprep.subr.mxu0 %v121_v5  ;;  %v104_v26 = vld [vmem:[#allocation2 + $0x50] sm:$0xff]  ;;  %v105_v27 = vld [vmem:[#allocation2 + $0x58] sm:$0xff]  ;;  %v106_v28 = vld [vmem:[#allocation2 + $0x60] sm:$0xff] }
  0x3b   :  { %875 = vmatpush3.msra.mxu0 %v121_v5  ;;  %v107_v29 = vld [vmem:[#allocation2 + $0x68] sm:$0xff]  ;;  %v108_v30 = vld [vmem:[#allocation2 + $0x70] sm:$0xff]  ;;  %v109_v31 = vld [vmem:[#allocation2 + $0x78] sm:$0xff] }
  0x3c   :  { %876 = vmatprep.subr.mxu0 %v120_v6  ;;  %v543_v32 = vld [vmem:[#allocation8 + $0x78] sm:$0xff]  ;;  %v542_v33 = vld [vmem:[#allocation8 + $0x70] sm:$0xff]  ;;  %v541_v34 = vld [vmem:[#allocation8 + $0x68] sm:$0xff] }
  0x3d   :  { %877 = vmatpush3.msra.mxu0 %v120_v6  ;;  %922 = vmatprep.subr.mxu1 %v543_v32  ;;  %v540_v35 = vld [vmem:[#allocation8 + $0x60] sm:$0xff]  ;;  %v539_v36 = vld [vmem:[#allocation8 + $0x58] sm:$0xff]  ;;  %v538_v37 = vld [vmem:[#allocation8 + $0x50] sm:$0xff] }
  0x3e   :  { %878 = vmatprep.subr.mxu0 %v119_v7  ;;  %923 = vmatpush3.msra.mxu1 %v543_v32  ;;  %v537_v38 = vld [vmem:[#allocation8 + $0x48] sm:$0xff]  ;;  %v536_v39 = vld [vmem:[#allocation8 + $0x40] sm:$0xff]  ;;  %v535_v40 = vld [vmem:[#allocation8 + $0x38] sm:$0xff] }
  0x3f   :  { %879 = vmatpush3.msra.mxu0 %v119_v7  ;;  %924 = vmatprep.subr.mxu1 %v542_v33  ;;  %v534_v41 = vld [vmem:[#allocation8 + $0x30] sm:$0xff]  ;;  %v533_v42 = vld [vmem:[#allocation8 + $0x28] sm:$0xff]  ;;  %v532_v43 = vld [vmem:[#allocation8 + $0x20] sm:$0xff] }
  0x40   :  { %880 = vmatprep.subr.mxu0 %v118_v8  ;;  %925 = vmatpush3.msra.mxu1 %v542_v33  ;;  %v531_v44 = vld [vmem:[#allocation8 + $0x18] sm:$0xff]  ;;  %v530_v45 = vld [vmem:[#allocation8 + $0x10] sm:$0xff]  ;;  %v529_v46 = vld [vmem:[#allocation8 + $0x8] sm:$0xff] }
  0x41   :  { %881 = vmatpush3.msra.mxu0 %v118_v8  ;;  %926 = vmatprep.subr.mxu1 %v541_v34  ;;  %v528_v47 = vld [vmem:[#allocation8] sm:$0xff]  ;;  %v1154_v48 = vld [vmem:[#allocation5] ss:$0 sm:$0xff] }
  0x42   :  { %882 = vmatprep.subr.mxu0 %v117_v9  ;;  %927 = vmatpush3.msra.mxu1 %v541_v34 }
  0x43   :  { %883 = vmatpush3.msra.mxu0 %v117_v9  ;;  %928 = vmatprep.subr.mxu1 %v540_v35 }
  0x44   :  { %884 = vmatprep.subr.mxu0 %v116_v10  ;;  %929 = vmatpush3.msra.mxu1 %v540_v35 }
  0x45   :  { %885 = vmatpush3.msra.mxu0 %v116_v10  ;;  %930 = vmatprep.subr.mxu1 %v539_v36 }
  0x46   :  { %886 = vmatprep.subr.mxu0 %v115_v11  ;;  %931 = vmatpush3.msra.mxu1 %v539_v36 }
  0x47   :  { %887 = vmatpush3.msra.mxu0 %v115_v11  ;;  %932 = vmatprep.subr.mxu1 %v538_v37 }
  0x48   :  { %888 = vmatprep.subr.mxu0 %v114_v12  ;;  %933 = vmatpush3.msra.mxu1 %v538_v37 }
  0x49   :  { %889 = vmatpush3.msra.mxu0 %v114_v12  ;;  %934 = vmatprep.subr.mxu1 %v537_v38 }
  0x4a   :  { %890 = vmatprep.subr.mxu0 %v113_v13  ;;  %935 = vmatpush3.msra.mxu1 %v537_v38 }
  0x4b   :  { %891 = vmatpush3.msra.mxu0 %v113_v13  ;;  %936 = vmatprep.subr.mxu1 %v536_v39 }
  0x4c   :  { %892 = vmatprep.subr.mxu0 %v112_v14  ;;  %937 = vmatpush3.msra.mxu1 %v536_v39 }
  0x4d   :  { %893 = vmatpush3.msra.mxu0 %v112_v14  ;;  %938 = vmatprep.subr.mxu1 %v535_v40 }
  0x4e   :  { %894 = vmatprep.subr.mxu0 %v111_v15  ;;  %939 = vmatpush3.msra.mxu1 %v535_v40 }
  0x4f   :  { %895 = vmatpush3.msra.mxu0 %v111_v15  ;;  %940 = vmatprep.subr.mxu1 %v534_v41 }
  0x50   :  { %896 = vmatprep.subr.mxu0 %v110_v16  ;;  %941 = vmatpush3.msra.mxu1 %v534_v41 }
  0x51   :  { %897 = vmatpush3.msra.mxu0 %v110_v16  ;;  %942 = vmatprep.subr.mxu1 %v533_v42 }
  0x52   :  { %899 = vmatmul.mubr.f32.vlgmr.msra.gmra.mxu0 %v95_v17  ;;  %943 = vmatpush3.msra.mxu1 %v533_v42 }
  0x53   :  { %901 = vmatprep.mubr.f32.mxu0 %v96_v18  ;;  %944 = vmatprep.subr.mxu1 %v532_v43 }
  0x54   :  { %945 = vmatpush3.msra.mxu1 %v532_v43 }
  0x55   :  { %946 = vmatprep.subr.mxu1 %v531_v44 }
  0x56   :  { %902 = vmatmul.mubr.f32.gmra.mxu0 %v97_v19  ;;  %947 = vmatpush3.msra.mxu1 %v531_v44 }
  0x57   :  { %904 = vmatprep.mubr.f32.mxu0 %v98_v20  ;;  %948 = vmatprep.subr.mxu1 %v530_v45 }
  0x58   :  { %949 = vmatpush3.msra.mxu1 %v530_v45 }
  0x59   :  { %950 = vmatprep.subr.mxu1 %v529_v46 }
  0x5a   :  { %905 = vmatmul.mubr.f32.gmra.mxu0 %v99_v21  ;;  %951 = vmatpush3.msra.mxu1 %v529_v46 }
  0x5b   :  { %907 = vmatprep.mubr.f32.mxu0 %v100_v22  ;;  %952 = vmatprep.subr.mxu1 %v528_v47 }
  0x5c   :  { %953 = vmatpush3.msra.mxu1 %v528_v47 }
  0x5e   :  { %908 = vmatmul.mubr.f32.gmra.mxu0 %v101_v23 }
  0x5f   :  { %910 = vmatprep.mubr.f32.mxu0 %v102_v24 }
  0x62   :  { %911 = vmatmul.mubr.f32.gmra.mxu0 %v103_v25 }
  0x63   :  { %913 = vmatprep.mubr.f32.mxu0 %v104_v26 }
  0x66   :  { %914 = vmatmul.mubr.f32.gmra.mxu0 %v105_v27 }
  0x67   :  { %916 = vmatprep.mubr.f32.mxu0 %v106_v28 }
  0x6a   :  { %917 = vmatmul.mubr.f32.gmra.mxu0 %v107_v29 }
  0x6b   :  { %919 = vmatprep.mubr.f32.mxu0 %v108_v30 }
  0x6e   :  { %920 = vmatmul.mubr.f32.gmra.mxu0 %v109_v31 }
 0x112   :  { %v900_v49 = vpop.f32.mrf.mxu0 }
 0x113   :  { %v1157_v50 = vadd.f32 %v900_v49, %v1154_v48 }
 0x114   :  { %v197_v51 = vpop.f32.mrf.mxu0 }
 0x115   :  { %v342_v52 = vmul.f32 0.0, %v1157_v50  ;;  %v1161_v53 = vadd.f32 %v1154_v48, %v197_v51 }
 0x116   :  { %v903_v54 = vpop.f32.mrf.mxu0 }
 0x117   :  { %v1164_v55 = vadd.f32 %v903_v54, %v1154_v48  ;;  %v380_v57 = vmul.f32 %v342_v52, %v1157_v50  ;;  %v379_v58 = vmul.f32 %v1161_v53, %v1161_v53  ;;  %v357_v61 = vadd.f32 %v342_v52, %v1161_v53 }
 0x118   :  { %v207_v56 = vpop.f32.mrf.mxu0 }
 0x119   :  { %v1170_v59 = vadd.f32 %v1154_v48, %v207_v56  ;;  %v344_v62 = vmul.f32 0.0, %v1164_v55  ;;  %v395_v2 = vadd.f32 %v380_v57, %v379_v58 }
 0x11a   :  { %v906_v60 = vpop.f32.mrf.mxu0 }
 0x11b   :  { %v343_v63 = vmul.f32 0.0, %v1170_v59  ;;  %v1176_v0 = vadd.f32 %v906_v60, %v1154_v48  ;;  %v382_v8 = vmul.f32 %v344_v62, %v1164_v55 }
 0x11c   :  { %v217_v1 = vpop.f32.mrf.mxu0 }
 0x11d   :  { %v358_v3 = vadd.f32 %v357_v61, %v343_v63  ;;  %v381_v4 = vmul.f32 %v343_v63, %v1170_v59  ;;  %v1180_v5 = vadd.f32 %v1154_v48, %v217_v1  ;;  %v346_v6 = vmul.f32 0.0, %v1176_v0 }
 0x11e   :  { %v909_v7 = vpop.f32.mrf.mxu0 }
 0x11f   :  { %v396_v9 = vadd.f32 %v395_v2, %v381_v4  ;;  %v345_v10 = vmul.f32 0.0, %v1180_v5  ;;  %v359_v11 = vadd.f32 %v358_v3, %v344_v62  ;;  %v1186_v12 = vadd.f32 %v909_v7, %v1154_v48 }
 0x120   :  { %v227_v13 = vpop.f32.mrf.mxu0  ;;  %v384_v18 = vmul.f32 %v346_v6, %v1176_v0 }
 0x121   :  { %v360_v14 = vadd.f32 %v359_v11, %v345_v10  ;;  %v383_v15 = vmul.f32 %v345_v10, %v1180_v5  ;;  %v397_v16 = vadd.f32 %v396_v9, %v382_v8  ;;  %v1190_v17 = vadd.f32 %v1154_v48, %v227_v13 }
 0x122   :  { %v912_v19 = vpop.f32.mrf.mxu0  ;;  %v348_v21 = vmul.f32 0.0, %v1186_v12 }
 0x123   :  { %v398_v20 = vadd.f32 %v397_v16, %v383_v15  ;;  %v347_v22 = vmul.f32 0.0, %v1190_v17  ;;  %v361_v23 = vadd.f32 %v360_v14, %v346_v6  ;;  %v1196_v24 = vadd.f32 %v912_v19, %v1154_v48 }
 0x124   :  { %v237_v25 = vpop.f32.mrf.mxu0  ;;  %v386_v31 = vmul.f32 %v348_v21, %v1186_v12 }
 0x125   :  { %v362_v26 = vadd.f32 %v361_v23, %v347_v22  ;;  %v385_v27 = vmul.f32 %v347_v22, %v1190_v17  ;;  %v399_v28 = vadd.f32 %v398_v20, %v384_v18  ;;  %v1200_v29 = vadd.f32 %v1154_v48, %v237_v25 }
 0x126   :  { %v915_v30 = vpop.f32.mrf.mxu0  ;;  %v350_v35 = vmul.f32 0.0, %v1196_v24 }
 0x127   :  { %v400_v32 = vadd.f32 %v399_v28, %v385_v27  ;;  %v363_v33 = vadd.f32 %v362_v26, %v348_v21  ;;  %v1204_v34 = vadd.f32 %v915_v30, %v1154_v48  ;;  %v349_v36 = vmul.f32 0.0, %v1200_v29 }
 0x128   :  { %v247_v37 = vpop.f32.mrf.mxu0  ;;  %v388_v45 = vmul.f32 %v350_v35, %v1196_v24 }
 0x129   :  { %v401_v38 = vadd.f32 %v400_v32, %v386_v31  ;;  %v1209_v39 = vadd.f32 %v1154_v48, %v247_v37  ;;  %v364_v40 = vadd.f32 %v363_v33, %v349_v36  ;;  %v387_v41 = vmul.f32 %v349_v36, %v1200_v29 }
 0x12a   :  { %v918_v42 = vpop.f32.mrf.mxu0  ;;  %v352_v43 = vmul.f32 0.0, %v1204_v34 }
 0x12b   :  { %v351_v44 = vmul.f32 0.0, %v1209_v39  ;;  %v402_v46 = vadd.f32 %v401_v38, %v387_v41  ;;  %v365_v47 = vadd.f32 %v364_v40, %v350_v35  ;;  %v1216_v49 = vadd.f32 %v918_v42, %v1154_v48 }
 0x12c   :  { %v257_v51 = vpop.f32.mrf.mxu0  ;;  %v390_v60 = vmul.f32 %v352_v43, %v1204_v34 }
 0x12d   :  { %v389_v52 = vmul.f32 %v351_v44, %v1209_v39  ;;  %v1220_v54 = vadd.f32 %v1154_v48, %v257_v51  ;;  %v366_v56 = vadd.f32 %v365_v47, %v351_v44  ;;  %v403_v57 = vadd.f32 %v402_v46, %v388_v45  ;;  %v1249_v51 = vld [vmem:[#allocation5 + $0x1] ss:$0 sm:$0xff] }
 0x12e   :  { %v921_v58 = vpop.f32.mrf.mxu0  ;;  %v354_v63 = vmul.f32 0.0, %v1216_v49 }
 0x12f   :  { %v353_v61 = vmul.f32 0.0, %v1220_v54  ;;  %v404_v62 = vadd.f32 %v403_v57, %v389_v52  ;;  %v367_v1 = vadd.f32 %v366_v56, %v352_v43  ;;  %v1226_v2 = vadd.f32 %v921_v58, %v1154_v48 }
 0x130   :  { %v267_v3 = vpop.f32.mrf.mxu0  ;;  %v392_v10 = vmul.f32 %v354_v63, %v1216_v49 }
 0x131   :  { %v391_v4 = vmul.f32 %v353_v61, %v1220_v54  ;;  %v1230_v6 = vadd.f32 %v1154_v48, %v267_v3  ;;  %v368_v7 = vadd.f32 %v367_v1, %v353_v61  ;;  %v405_v8 = vadd.f32 %v404_v62, %v390_v60 }
 0x132   :  { %v356_v13 = vmul.f32 0.0, %v1226_v2 }
 0x133   :  { %v355_v9 = vmul.f32 0.0, %v1230_v6  ;;  %v406_v11 = vadd.f32 %v405_v8, %v391_v4  ;;  %v369_v14 = vadd.f32 %v368_v7, %v354_v63 }
 0x134   :  { %v394_v19 = vmul.f32 %v356_v13, %v1226_v2 }
 0x135   :  { %v393_v15 = vmul.f32 %v355_v9, %v1230_v6  ;;  %v370_v16 = vadd.f32 %v369_v14, %v355_v9  ;;  %v407_v18 = vadd.f32 %v406_v11, %v392_v10 }
 0x137   :  { %v371_v20 = vadd.f32 %v370_v16, %v356_v13  ;;  %v408_v21 = vadd.f32 %v407_v18, %v393_v15 }
 0x139   :  { %v372_v48 = vrot.slane %v371_v20, 4  ;;  %v409_v22 = vadd.f32 %v408_v21, %v394_v19 }
 0x13b   :  { %v373_v23 = vadd.f32 %v372_v48, %v371_v20  ;;  %v410_v25 = vrot.slane %v409_v22, 4 }
 0x13d   :  { %v374_v26 = vrot.slane %v373_v23, 2  ;;  %v411_v27 = vadd.f32 %v410_v25, %v409_v22 }
 0x13f   :  { %v375_v28 = vadd.f32 %v374_v26, %v373_v23  ;;  %v412_v30 = vrot.slane %v411_v27, 2 }
 0x141   :  { %v376_v31 = vrot.slane %v375_v28, 1  ;;  %v413_v32 = vadd.f32 %v412_v30, %v411_v27 }
 0x143   :  { %v377_v33 = vadd.f32 %v376_v31, %v375_v28  ;;  %v414_v35 = vrot.slane %v413_v32, 1 }
 0x145   :  { %v1237_v36 = vmul.f32 0.125, %v377_v33  ;;  %v415_v37 = vadd.f32 %v414_v35, %v413_v32 }
 0x147   :  { %v416_v38 = vmul.f32 0.125, %v415_v37  ;;  %v417_v40 = vmul.f32 %v1237_v36, %v1237_v36  ;;  %v420_v44 = vsub.f32 %v1161_v53, %v1237_v36  ;;  %v421_v45 = vsub.f32 %v1157_v50, %v1237_v36  ;;  %v1258_v50 = vld [vmem:[#allocation5 + $0x2] ss:$0 sm:$0xff] }
 0x148   :  { %v422_v46 = vsub.f32 %v1170_v59, %v1237_v36  ;;  %v423_v52 = vsub.f32 %v1164_v55, %v1237_v36  ;;  %v424_v56 = vsub.f32 %v1180_v5, %v1237_v36  ;;  %v425_v61 = vsub.f32 %v1176_v0, %v1237_v36 }
 0x149   :  { %v418_v41 = vsub.f32 %v416_v38, %v417_v40  ;;  %v426_v55 = vsub.f32 %v1190_v17, %v1237_v36  ;;  %v427_v9 = vsub.f32 %v1186_v12, %v1237_v36  ;;  %v428_v13 = vsub.f32 %v1200_v29, %v1237_v36 }
 0x14a   :  { %v429_v12 = vsub.f32 %v1196_v24, %v1237_v36  ;;  %v430_v29 = vsub.f32 %v1209_v39, %v1237_v36  ;;  %v431_v24 = vsub.f32 %v1204_v34, %v1237_v36  ;;  %v432_v39 = vsub.f32 %v1220_v54, %v1237_v36 }
 0x14b   :  { %v419_v42 = vmax.f32 %v418_v41, 0.0  ;;  %v433_v34 = vsub.f32 %v1216_v49, %v1237_v36  ;;  %v434_v54 = vsub.f32 %v1230_v6, %v1237_v36  ;;  %v435_v49 = vsub.f32 %v1226_v2, %v1237_v36 }
 0x14d   :  { %v436_v43 = vadd.f32 1e-05, %v419_v42 }
 0x14f   :  { %986 = vrsqrt.f32 %v436_v43 }
 0x15c   :  { %v1247_v47 = vpop.eup %986 }
 0x15d   :  { %v438_v57 = vmul.f32 %v1247_v47, %v420_v44  ;;  %v439_v53 = vmul.f32 %v1247_v47, %v421_v45  ;;  %v440_v58 = vmul.f32 %v1247_v47, %v422_v46  ;;  %v441_v59 = vmul.f32 %v1247_v47, %v423_v52 }
 0x15e   :  { %v442_v60 = vmul.f32 %v1247_v47, %v424_v56  ;;  %v443_v3 = vmul.f32 %v1247_v47, %v425_v61  ;;  %v444_v4 = vmul.f32 %v1247_v47, %v426_v55  ;;  %v445_v16 = vmul.f32 %v1247_v47, %v427_v9 }
 0x15f   :  { %v459_v5 = vmul.f32 %v1249_v51, %v438_v57  ;;  %v460_v62 = vmul.f32 %v1249_v51, %v439_v53  ;;  %v461_v63 = vmul.f32 %v1249_v51, %v440_v58  ;;  %v462_v1 = vmul.f32 %v1249_v51, %v441_v59 }
 0x160   :  { %v463_v17 = vmul.f32 %v1249_v51, %v442_v60  ;;  %v464_v15 = vmul.f32 %v1249_v51, %v443_v3  ;;  %v465_v20 = vmul.f32 %v1249_v51, %v444_v4  ;;  %v446_v21 = vmul.f32 %v1247_v47, %v428_v13 }
 0x161   :  { %v480_v7 = vadd.f32 %v1258_v50, %v459_v5  ;;  %v481_v8 = vadd.f32 %v1258_v50, %v460_v62  ;;  %v482_v0 = vadd.f32 %v1258_v50, %v461_v63  ;;  %v483_v14 = vadd.f32 %v1258_v50, %v462_v1 }
 0x162   :  { %v484_v19 = vadd.f32 %v1258_v50, %v463_v17  ;;  %v485_v22 = vadd.f32 %v1258_v50, %v464_v15  ;;  %v466_v23 = vmul.f32 %v1249_v51, %v445_v16  ;;  %v447_v25 = vmul.f32 %v1247_v47, %v429_v12 }
 0x163   :  { %v496_v10 = vmax.f32 %v480_v7, 0.0  ;;  %v497_v11 = vmax.f32 %v481_v8, 0.0  ;;  %v498_v18 = vmax.f32 %v482_v0, 0.0  ;;  %v499_v48 = vmax.f32 %v483_v14, 0.0  ;;  %v801_v8 = vld [vmem:[%s1340_s4] ss:$0 sm:$0xff] }
 0x164   :  { %v500_v26 = vmax.f32 %v484_v19, 0.0  ;;  %v486_v27 = vadd.f32 %v1258_v50, %v465_v20  ;;  %v467_v28 = vmul.f32 %v1249_v51, %v446_v21  ;;  %v448_v30 = vmul.f32 %v1247_v47, %v430_v29  ;;  %s1102_s4 = smov [#allocation10]  }
 0x165   :  { %954 = vmatprep.mubr.f32.mxu1 %v496_v10  ;;  %v501_v31 = vmax.f32 %v485_v22, 0.0  ;;  %v487_v32 = vadd.f32 %v1258_v50, %v466_v23  ;;  %v468_v33 = vmul.f32 %v1249_v51, %v447_v25  ;;  %v449_v35 = vmul.f32 %v1247_v47, %v431_v24  ;;  %s784_s13 = sshll.u32 %s1102_s4, 4  ;;  %s785_s13 = int_to_ptr.vmem [resolvable:$true] %s784_s13 }
 0x166   :  { %955 = vmatmul.mubr.f32.vlgmr.msra.gmra.mxu1 %v497_v11  ;;  %v502_v37 = vmax.f32 %v486_v27, 0.0  ;;  %v488_v38 = vadd.f32 %v1258_v50, %v467_v28  ;;  %v469_v40 = vmul.f32 %v1249_v51, %v448_v30  ;;  %v450_v41 = vmul.f32 %v1247_v47, %v432_v39  ;;  %s1068_s14 = scalar_lea.vmem %s785_s13, 2048  ;;  %p1073_p7 = scmp.lt.s32.totalorder %s785_s13, %s785_s13 }
 0x167   :  { %957 = vmatprep.mubr.f32.mxu1 %v498_v18  ;;  %v503_v42 = vmax.f32 %v487_v32, 0.0  ;;  %v489_v43 = vadd.f32 %v1258_v50, %v468_v33  ;;  %v470_v44 = vmul.f32 %v1249_v51, %v449_v35  ;;  %v451_v45 = vmul.f32 %v1247_v47, %v433_v34  ;;  %p1069_p6 = scmp.ne.s32.totalorder %s785_s13, %s1068_s14  ;;  %p1074_p8 = scmp.lt.s32.totalorder %s1068_s14, %s1068_s14 }
 0x168   :  { %v452_v46 = vmul.f32 %v1247_v47, %v434_v54  ;;  %v504_v52 = vmax.f32 %v488_v38, 0.0  ;;  %v490_v56 = vadd.f32 %v1258_v50, %v469_v40  ;;  %v471_v57 = vmul.f32 %v1249_v51, %v450_v41 }
 0x169   :  { %v505_v6 = vmax.f32 %v489_v43, 0.0  ;;  %v491_v53 = vadd.f32 %v1258_v50, %v470_v44  ;;  %v472_v58 = vmul.f32 %v1249_v51, %v451_v45  ;;  %v453_v59 = vmul.f32 %v1247_v47, %v435_v49  ;;  %p1075_p9 = por %p1074_p8, %p1073_p7 }
 0x16a   :  { %958 = vmatmul.mubr.f32.gmra.mxu1 %v499_v48  ;;  %v506_v60 = vmax.f32 %v490_v56, 0.0  ;;  %v492_v61 = vadd.f32 %v1258_v50, %v471_v57  ;;  %v473_v55 = vmul.f32 %v1249_v51, %v452_v46 }
 0x16b   :  { %960 = vmatprep.mubr.f32.mxu1 %v500_v26  ;;  %v507_v5 = vmax.f32 %v491_v53, 0.0  ;;  %v493_v62 = vadd.f32 %v1258_v50, %v472_v58  ;;  %v474_v2 = vmul.f32 %v1249_v51, %v453_v59  ;;  %p1076_p10 = pnand %p1075_p9, %p1069_p6 }
 0x16c   :  { %v508_v36 = vmax.f32 %v492_v61, 0.0  ;;  %v494_v63 = vadd.f32 %v1258_v50, %v473_v55 }
 0x16d   :  { %v509_v1 = vmax.f32 %v493_v62, 0.0  ;;  %v495_v47 = vadd.f32 %v1258_v50, %v474_v2 }
 0x16e   :  { %961 = vmatmul.mubr.f32.gmra.mxu1 %v501_v31  ;;  %v510_v3 = vmax.f32 %v494_v63, 0.0 }
 0x16f   :  { %963 = vmatprep.mubr.f32.mxu1 %v502_v37  ;;  %v511_v4 = vmax.f32 %v495_v47, 0.0 }
 0x172   :  { %964 = vmatmul.mubr.f32.gmra.mxu1 %v503_v42 }
 0x173   :  { %966 = vmatprep.mubr.f32.mxu1 %v504_v52 }
 0x176   :  { %967 = vmatmul.mubr.f32.gmra.mxu1 %v505_v6 }
 0x177   :  { %969 = vmatprep.mubr.f32.mxu1 %v506_v60 }
 0x17a   :  { %970 = vmatmul.mubr.f32.gmra.mxu1 %v507_v5 }
 0x17b   :  { %972 = vmatprep.mubr.f32.mxu1 %v508_v36 }
 0x17e   :  { %973 = vmatmul.mubr.f32.gmra.mxu1 %v509_v1 }
 0x17f   :  { %975 = vmatprep.mubr.f32.mxu1 %v510_v3 }
 0x182   :  { %976 = vmatmul.mubr.f32.gmra.mxu1 %v511_v4 }
 0x226   :  { %v956_v7 = vpop.f32.mrf.mxu1 }
 0x227   :  { %v748_v51 = vadd.f32 %v956_v7, %v801_v8 }
 0x228   :  { %v610_v0 = vpop.f32.mrf.mxu1 }
 0x229   :  { %764 = vst [vmem:[#allocation10 + $0x8] sm:$0xff] %v748_v51  ;;  %v747_v9 = vadd.f32 %v801_v8, %v610_v0 }
 0x22a   :  { %v959_v17 = vpop.f32.mrf.mxu1 }
 0x22b   :  { %763 = vst [vmem:[#allocation10] sm:$0xff] %v747_v9  ;;  %v750_v11 = vadd.f32 %v959_v17, %v801_v8 }
 0x22c   :  { %v620_v10 = vpop.f32.mrf.mxu1 }
 0x22d   :  { %766 = vst [vmem:[#allocation10 + $0x18] sm:$0xff] %v750_v11  ;;  %v749_v50 = vadd.f32 %v801_v8, %v620_v10 }
 0x22e   :  { %v962_v13 = vpop.f32.mrf.mxu1 }
 0x22f   :  { %765 = vst [vmem:[#allocation10 + $0x10] sm:$0xff] %v749_v50  ;;  %v752_v15 = vadd.f32 %v962_v13, %v801_v8 }
 0x230   :  { %v630_v14 = vpop.f32.mrf.mxu1 }
 0x231   :  { %768 = vst [vmem:[#allocation10 + $0x28] sm:$0xff] %v752_v15  ;;  %v751_v18 = vadd.f32 %v801_v8, %v630_v14 }
 0x232   :  { %v965_v16 = vpop.f32.mrf.mxu1 }
 0x233   :  { %767 = vst [vmem:[#allocation10 + $0x20] sm:$0xff] %v751_v18  ;;  %v754_v20 = vadd.f32 %v965_v16, %v801_v8 }
 0x234   :  { %v640_v19 = vpop.f32.mrf.mxu1 }
 0x235   :  { %770 = vst [vmem:[#allocation10 + $0x38] sm:$0xff] %v754_v20  ;;  %v753_v12 = vadd.f32 %v801_v8, %v640_v19 }
 0x236   :  { %v968_v21 = vpop.f32.mrf.mxu1 }
 0x237   :  { %769 = vst [vmem:[#allocation10 + $0x30] sm:$0xff] %v753_v12  ;;  %v756_v48 = vadd.f32 %v968_v21, %v801_v8 }
 0x238   :  { %v650_v29 = vpop.f32.mrf.mxu1 }
 0x239   :  { %772 = vst [vmem:[#allocation10 + $0x48] sm:$0xff] %v756_v48  ;;  %v755_v23 = vadd.f32 %v801_v8, %v650_v29 }
 0x23a   :  { %v971_v22 = vpop.f32.mrf.mxu1 }
 0x23b   :  { %771 = vst [vmem:[#allocation10 + $0x40] sm:$0xff] %v755_v23  ;;  %v758_v26 = vadd.f32 %v971_v22, %v801_v8 }
 0x23c   :  { %v660_v25 = vpop.f32.mrf.mxu1 }
 0x23d   :  { %774 = vst [vmem:[#allocation10 + $0x58] sm:$0xff] %v758_v26  ;;  %v757_v28 = vadd.f32 %v801_v8, %v660_v25 }
 0x23e   :  { %v974_v27 = vpop.f32.mrf.mxu1 }
 0x23f   :  { %773 = vst [vmem:[#allocation10 + $0x50] sm:$0xff] %v757_v28  ;;  %v760_v24 = vadd.f32 %v974_v27, %v801_v8 }
 0x240   :  { %v670_v30 = vpop.f32.mrf.mxu1 }
 0x241   :  { %776 = vst [vmem:[#allocation10 + $0x68] sm:$0xff] %v760_v24  ;;  %v759_v31 = vadd.f32 %v801_v8, %v670_v30 }
 0x242   :  { %v977_v39 = vpop.f32.mrf.mxu1 }
 0x243   :  { %775 = vst [vmem:[#allocation10 + $0x60] sm:$0xff] %v759_v31  ;;  %v762_v33 = vadd.f32 %v977_v39, %v801_v8 }
 0x244   :  { %v680_v32 = vpop.f32.mrf.mxu1 }
 0x245   :  { %778 = vst [vmem:[#allocation10 + $0x78] sm:$0xff] %v762_v33  ;;  %v761_v35 = vadd.f32 %v801_v8, %v680_v32 }
 0x247   :  { %777 = vst [vmem:[#allocation10 + $0x70] sm:$0xff] %v761_v35 }
 0x248   :  { %1079 = shalt.err (!%p1076_p10)
}
 0x249   :  { %790 = dma.vmem_to_hbm [thread:$0]  %s785_s13, 2048, %s1341_s5, [#allocation4], %s1098_s26, %s1098_s26, %s1099_s27  }
 0x24a   :  { %1094 = dma.done.wait [#allocation4], 2048  }
 0x24b   :  { %1095 = vsyncadd [#allocation4], 4294965248 }
 0x24c   :  { %794 = vsyncpa [#allocation3], 1 }
 0x24d   :  { %795 = vsyncpa [#allocation6], 1 }
 0x24e   :  { %796 = vsyncpa [#allocation9], 1 }
 0x24f   :  { %797 = vsyncpa [#allocation4], 1 }

</bundles_post_ra>
